<compile_context>
chip_gen: v6e
topology: v6e:2x2x1
jax: 0.10.0
libtpu: 0.0.40
codegen_flags: <defaults>
</compile_context>

<pallas_src>
import math

import jax
import jax.numpy as jnp
from jax.experimental import pallas as pl
from jax.experimental.pallas import tpu as pltpu


def _loss_stats_kernel(x_ref, t_ref, out_ref):
    """Hot path for one (sample, spatial-tile) grid step.

    x_ref:   (1, C, S_TILE, 128) logits (any float dtype; upcast to f32)
    t_ref:   (1, S_TILE, 128)    int32 class labels (padding sentinel = -1)
    out_ref: (1, 4, C_PAD, 128)  f32 accumulator, VMEM-resident across the
             spatial grid axis.  Lane-partial sums (finished in XLA):
               [0, c, :] = sum_pixels softmax_c * onehot_c    (-> tp)
               [1, c, :] = sum_pixels softmax_c               (-> tp + fp)
               [2, c, :] = sum_pixels onehot_c                (-> tp + fn)
               [3, 0, :] = sum_pixels -log softmax[true]      (-> CE sum)
    """
    k = pl.program_id(1)
    C = x_ref.shape[1]

    @pl.when(k == 0)
    def _init():
        out_ref[...] = jnp.zeros_like(out_ref)

    t = t_ref[0]                                                # (S_TILE, 128) i32
    xs = [x_ref[0, c].astype(jnp.float32) for c in range(C)]    # C x (S_TILE, 128)

    # Numerically-stable softmax over channels, unrolled over the (small,
    # static) channel count: pure VALU/EUP elementwise ops on full pixel tiles.
    m = xs[0]
    for c in range(1, C):
        m = jnp.maximum(m, xs[c])
    zs = [jnp.exp(xc - m) for xc in xs]                         # EUP
    s = zs[0]
    for c in range(1, C):
        s = s + zs[c]
    inv_s = pl.reciprocal(s, approx=True)                       # EUP vrcp (cheap slot)
    log_s = jnp.log(s)                                          # EUP

    # Hoisted constants (broadcast_in_dim is not CSE'd by JAX).
    zero = jnp.zeros_like(m)
    one = jnp.ones_like(m)

    x_true = zero
    for c in range(C):
        mc = t == c                                             # reuse the compare
        p_c = zs[c] * inv_s
        # Partial sums over the sublane axis only; keep the 128 lanes so the
        # output stays lane-dense and f32 accumulation error stays tiny.
        out_ref[0, 0, c:c + 1, :] += jnp.sum(jnp.where(mc, p_c, zero),
                                             axis=0, keepdims=True)
        out_ref[0, 1, c:c + 1, :] += jnp.sum(p_c, axis=0, keepdims=True)
        out_ref[0, 2, c:c + 1, :] += jnp.sum(jnp.where(mc, one, zero),
                                             axis=0, keepdims=True)
        x_true = jnp.where(mc, xs[c], x_true)

    # Cross-entropy: -log softmax[true] = log(sum exp) + max - logit_true
    out_ref[0, 3, 0:1, :] += jnp.sum(log_s + m - x_true, axis=0, keepdims=True)


_LOGITS_TILE_BYTES = 2 * 1024 * 1024   # ~2 MiB of logits per grid step


def _pick_s_tile(S: int, C: int, itemsize: int) -> int:
    """Spatial tile (in 128-pixel rows).  Full extent if it fits the VMEM
    budget (always a legal block dim); otherwise the largest multiple-of-8
    divisor of S under the cap; otherwise the cap itself (wrapper pads S)."""
    cap = max(8, (_LOGITS_TILE_BYTES // (max(C, 1) * 128 * itemsize)) // 8 * 8)
    if S <= cap:
        return S
    for t in range(cap, 7, -8):
        if S % t == 0:
            return t
    return cap


def dc_and_ce_loss(net_output, target, *, weight_ce=1.0, weight_dice=1.0,
                   smooth=1e-5, do_bg=False, batch_dice=False):
    """JAX wrapper: Pallas kernel computes softmax + lane-partial reductions,
    the tiny (B, C)-sized finalization stays in plain XLA.

    net_output: (B, C, *spatial) logits; target: (B, 1, *spatial) int labels.
    """
    B, C = net_output.shape[:2]
    spatial = tuple(net_output.shape[2:])
    assert target.shape == (B, 1) + spatial, (target.shape, net_output.shape)
    N = math.prod(spatial)

    S = -(-N // 128)                                   # rows of 128 pixels
    itemsize = jnp.dtype(net_output.dtype).itemsize
    S_TILE = _pick_s_tile(S, C, itemsize)
    S_pad = -(-S // S_TILE) * S_TILE
    N_pad = S_pad * 128
    num_k = S_pad // S_TILE
    C_PAD = max(8, -(-C // 8) * 8)

    # Pixel-dense layout: channels on the untiled major axis, pixels filling
    # the sublane x lane axes.  Padding (if any) uses zero logits / label -1
    # and is corrected analytically below.
    x3 = net_output.reshape(B, C, N)
    t2 = target.reshape(B, N).astype(jnp.int32)
    if N_pad != N:
        x3 = jnp.pad(x3, ((0, 0), (0, 0), (0, N_pad - N)))
        t2 = jnp.pad(t2, ((0, 0), (0, N_pad - N)), constant_values=-1)
    x4 = x3.reshape(B, C, S_pad, 128)
    t3 = t2.reshape(B, S_pad, 128)

    out = pl.pallas_call(
        _loss_stats_kernel,
        out_shape=jax.ShapeDtypeStruct((B, 4, C_PAD, 128), jnp.float32),
        grid_spec=pltpu.PrefetchScalarGridSpec(
            num_scalar_prefetch=0,
            grid=(B, num_k),
            in_specs=[
                pl.BlockSpec((1, C, S_TILE, 128), lambda b, k: (b, 0, k, 0)),
                pl.BlockSpec((1, S_TILE, 128), lambda b, k: (b, k, 0)),
            ],
            out_specs=pl.BlockSpec((1, 4, C_PAD, 128), lambda b, k: (b, 0, 0, 0)),
        ),
        compiler_params=pltpu.CompilerParams(
            dimension_semantics=("parallel", "arbitrary")),
    )(x4, t3)

    # Tiny epilogue on (B, 4, C_PAD, 128): finish the 128-lane partial sums.
    tp = jnp.sum(out[:, 0, :C, :], axis=-1)        # (B, C)
    sump = jnp.sum(out[:, 1, :C, :], axis=-1)      # (B, C)
    cnt = jnp.sum(out[:, 2, :C, :], axis=-1)       # (B, C)
    ce_sum = jnp.sum(out[:, 3, 0, :], axis=-1)     # (B,)

    n_extra = N_pad - N
    if n_extra:
        # Padded pixels: zero logits, label -1 => tp/cnt contributions are 0;
        # sum(p) gets n_extra/C per channel, CE gets n_extra*log(C) per sample.
        # Subtract exactly (only residual is the approx-reciprocal epsilon).
        sump = sump - (n_extra / C)
        ce_sum = ce_sum - n_extra * math.log(C)

    fp = sump - tp
    fn = cnt - tp
    if batch_dice:
        tp = jnp.sum(tp, axis=0)
        fp = jnp.sum(fp, axis=0)
        fn = jnp.sum(fn, axis=0)

    nominator = 2.0 * tp + smooth
    denominator = jnp.clip(2.0 * tp + fp + fn + smooth, 1e-8, None)
    dc = nominator / denominator
    if not do_bg:
        dc = dc[1:] if batch_dice else dc[:, 1:]
    dc_loss = -jnp.mean(dc)

    ce_loss = jnp.sum(ce_sum) / (B * N)

    # TODO(synk): the ignore_label / loss_mask branch of the module (unused
    # with the given constructor args, ignore_label=None) is not implemented.
    return weight_ce * ce_loss + weight_dice * dc_loss


def _reference_loss(net_output, target, *, weight_ce=1.0, weight_dice=1.0,
                    smooth=1e-5, do_bg=False):
    """Pure-JAX reference mirroring the PyTorch module (for verification)."""
    B, C = net_output.shape[:2]
    x = net_output.astype(jnp.float32)
    t = target[:, 0].astype(jnp.int32)                        # (B, *spatial)

    logp = jax.nn.log_softmax(x, axis=1)
    ce = -jnp.mean(jnp.take_along_axis(logp, t[:, None], axis=1))

    p = jax.nn.softmax(x, axis=1)
    onehot = jax.nn.one_hot(t, C, axis=1, dtype=jnp.float32)  # (B, C, *spatial)
    sp_axes = tuple(range(2, x.ndim))
    tp = jnp.sum(p * onehot, axis=sp_axes)
    fp = jnp.sum(p * (1.0 - onehot), axis=sp_axes)
    fn = jnp.sum((1.0 - p) * onehot, axis=sp_axes)
    dc = (2 * tp + smooth) / jnp.clip(2 * tp + fp + fn + smooth, 1e-8, None)
    if not do_bg:
        dc = dc[:, 1:]
    dc_loss = -jnp.mean(dc)
    return weight_ce * ce + weight_dice * dc_loss


if __name__ == "__main__":
    # Module "parameters": weight_ce=1, weight_dice=1, ignore_label=None,
    # smooth=1e-5, batch_dice=False, do_bg=False.
    key = jax.random.PRNGKey(0)

    test_shapes = [
        (2, 4, 16, 16),      # H*W multiple of 128, single spatial step
        (2, 4, 32, 32),      # larger 2-D patch
        (2, 4, 30, 34),      # ragged H*W -> exercises the padding path
        (2, 3, 8, 8, 8),     # 3-D patch -> exercises generic spatial flatten
    ]
    for shape in test_shapes:
        B, C = shape[:2]
        spatial = shape[2:]
        k_logits, k_target, key = jax.random.split(key, 3)
        net_output = jax.random.normal(k_logits, (B, C) + spatial, dtype=jnp.float32)
        target = jax.random.randint(k_target, (B, 1) + spatial, 0, C, dtype=jnp.int32)

        loss = jax.block_until_ready(dc_and_ce_loss(net_output, target))
        ref = _reference_loss(net_output, target)
        # Tolerance loosened slightly for the approx=True softmax reciprocal.
        assert jnp.allclose(loss, ref, atol=2e-3, rtol=2e-3), (loss, ref, shape)

    print("KERNEL_OK")
</pallas_src>

<mosaic_0001>
module attributes {stable_mosaic.version = 11 : i64} {
  func.func @_loss_stats_kernel(%arg0: i32, %arg1: i32, %arg2: memref<1x4x2x128xf32, #tpu.memory_space<vmem>>, %arg3: memref<1x2x128xi32, #tpu.memory_space<vmem>>, %arg4: memref<1x4x8x128xf32, #tpu.memory_space<vmem>>) attributes {dimension_semantics = [#tpu.dimension_semantics<parallel>, #tpu.dimension_semantics<arbitrary>], iteration_bounds = array<i64: 2, 1>, scalar_prefetch = 0 : i64, scratch_operands = 0 : i64, tpu.core_type = #tpu.core_type<tc>, window_params = [{transform_indices = @transform_0, window_bounds = array<i64: 1, 4, 2, 128>}, {transform_indices = @transform_1, window_bounds = array<i64: 1, 2, 128>}, {transform_indices = @transform_2, window_bounds = array<i64: 1, 4, 8, 128>}]} {
    %c0_i32 = arith.constant 0 : i32
    %0 = arith.cmpi eq, %arg1, %c0_i32 : i32
    %1 = arith.extui %0 : i1 to i32
    %c0_i32_0 = arith.constant 0 : i32
    %2 = arith.cmpi ne, %1, %c0_i32_0 : i32
    scf.if %2 {
      %cst_135 = arith.constant 0.000000e+00 : f32
      %161 = vector.broadcast %cst_135 : f32 to vector<1x4x8x128xf32>
      %c0_136 = arith.constant 0 : index
      %c0_137 = arith.constant 0 : index
      %c0_138 = arith.constant 0 : index
      %c0_139 = arith.constant 0 : index
      %162 = vector.load %arg4[%c0_136, %c0_137, %c0_138, %c0_139] : memref<1x4x8x128xf32, #tpu.memory_space<vmem>>, vector<1x4x8x128xf32>
      tpu.vector_store %arg4[%c0_136, %c0_137, %c0_138, %c0_139], %161 {strides = array<i32>} : memref<1x4x8x128xf32, #tpu.memory_space<vmem>>, vector<1x4x8x128xf32>,
    } else {
    }
    %c0 = arith.constant 0 : index
    %c0_1 = arith.constant 0 : index
    %c0_2 = arith.constant 0 : index
    %3 = vector.load %arg3[%c0, %c0_1, %c0_2] : memref<1x2x128xi32, #tpu.memory_space<vmem>>, vector<1x2x128xi32>
    %4 = vector.shape_cast %3 : vector<1x2x128xi32> to vector<2x128xi32>
    %c0_3 = arith.constant 0 : index
    %c0_4 = arith.constant 0 : index
    %c0_5 = arith.constant 0 : index
    %c0_6 = arith.constant 0 : index
    %5 = vector.load %arg2[%c0_3, %c0_4, %c0_5, %c0_6] : memref<1x4x2x128xf32, #tpu.memory_space<vmem>>, vector<1x1x2x128xf32>
    %6 = vector.shape_cast %5 : vector<1x1x2x128xf32> to vector<2x128xf32>
    %c0_7 = arith.constant 0 : index
    %c1 = arith.constant 1 : index
    %c0_8 = arith.constant 0 : index
    %c0_9 = arith.constant 0 : index
    %7 = vector.load %arg2[%c0_7, %c1, %c0_8, %c0_9] : memref<1x4x2x128xf32, #tpu.memory_space<vmem>>, vector<1x1x2x128xf32>
    %8 = vector.shape_cast %7 : vector<1x1x2x128xf32> to vector<2x128xf32>
    %c0_10 = arith.constant 0 : index
    %c2 = arith.constant 2 : index
    %c0_11 = arith.constant 0 : index
    %c0_12 = arith.constant 0 : index
    %9 = vector.load %arg2[%c0_10, %c2, %c0_11, %c0_12] : memref<1x4x2x128xf32, #tpu.memory_space<vmem>>, vector<1x1x2x128xf32>
    %10 = vector.shape_cast %9 : vector<1x1x2x128xf32> to vector<2x128xf32>
    %c0_13 = arith.constant 0 : index
    %c3 = arith.constant 3 : index
    %c0_14 = arith.constant 0 : index
    %c0_15 = arith.constant 0 : index
    %11 = vector.load %arg2[%c0_13, %c3, %c0_14, %c0_15] : memref<1x4x2x128xf32, #tpu.memory_space<vmem>>, vector<1x1x2x128xf32>
    %12 = vector.shape_cast %11 : vector<1x1x2x128xf32> to vector<2x128xf32>
    %13 = arith.maximumf %6, %8 : vector<2x128xf32>
    %14 = arith.maximumf %13, %10 : vector<2x128xf32>
    %15 = arith.maximumf %14, %12 : vector<2x128xf32>
    %16 = arith.subf %6, %15 : vector<2x128xf32>
    %17 = math.exp %16 : vector<2x128xf32>
    %18 = arith.subf %8, %15 : vector<2x128xf32>
    %19 = math.exp %18 : vector<2x128xf32>
    %20 = arith.subf %10, %15 : vector<2x128xf32>
    %21 = math.exp %20 : vector<2x128xf32>
    %22 = arith.subf %12, %15 : vector<2x128xf32>
    %23 = math.exp %22 : vector<2x128xf32>
    %24 = arith.addf %17, %19 : vector<2x128xf32>
    %25 = arith.addf %24, %21 : vector<2x128xf32>
    %26 = arith.addf %25, %23 : vector<2x128xf32>
    %27 = tpu.reciprocal %26 {approx = true} : vector<2x128xf32> -> vector<2x128xf32>
    %28 = math.log %26 : vector<2x128xf32>
    %cst = arith.constant 0.000000e+00 : f32
    %29 = vector.broadcast %cst : f32 to vector<2x128xf32>
    %cst_16 = arith.constant 1.000000e+00 : f32
    %30 = vector.broadcast %cst_16 : f32 to vector<2x128xf32>
    %c0_i32_17 = arith.constant 0 : i32
    %31 = vector.broadcast %c0_i32_17 : i32 to vector<2x128xi32>
    %32 = arith.cmpi eq, %4, %31 : vector<2x128xi32>
    %33 = arith.mulf %17, %27 : vector<2x128xf32>
    %c0_18 = arith.constant 0 : index
    %c0_19 = arith.constant 0 : index
    %c0_20 = arith.constant 0 : index
    %c0_21 = arith.constant 0 : index
    %34 = vector.load %arg4[%c0_18, %c0_19, %c0_20, %c0_21] : memref<1x4x8x128xf32, #tpu.memory_space<vmem>>, vector<1x1x1x128xf32>
    %35 = vector.shape_cast %34 : vector<1x1x1x128xf32> to vector<1x128xf32>
    %36 = arith.select %32, %33, %29 : vector<2x128xi1>, vector<2x128xf32>
    %cst_22 = arith.constant dense<0.000000e+00> : vector<128xf32>
    %37 = vector.multi_reduction <add>, %36, %cst_22 [0] : vector<2x128xf32> to vector<128xf32>
    %38 = vector.shape_cast %37 : vector<128xf32> to vector<1x128xf32>
    %39 = arith.addf %35, %38 : vector<1x128xf32>
    %c0_23 = arith.constant 0 : index
    %c0_24 = arith.constant 0 : index
    %c0_25 = arith.constant 0 : index
    %c0_26 = arith.constant 0 : index
    %40 = vector.load %arg4[%c0_23, %c0_24, %c0_25, %c0_26] : memref<1x4x8x128xf32, #tpu.memory_space<vmem>>, vector<1x1x1x128xf32>
    %41 = vector.shape_cast %40 : vector<1x1x1x128xf32> to vector<1x128xf32>
    %42 = vector.shape_cast %39 : vector<1x128xf32> to vector<1x1x1x128xf32>
    tpu.vector_store %arg4[%c0_23, %c0_24, %c0_25, %c0_26], %42 {strides = array<i32>} : memref<1x4x8x128xf32, #tpu.memory_space<vmem>>, vector<1x1x1x128xf32>,
    %c0_27 = arith.constant 0 : index
    %c1_28 = arith.constant 1 : index
    %c0_29 = arith.constant 0 : index
    %c0_30 = arith.constant 0 : index
    %43 = vector.load %arg4[%c0_27, %c1_28, %c0_29, %c0_30] : memref<1x4x8x128xf32, #tpu.memory_space<vmem>>, vector<1x1x1x128xf32>
    %44 = vector.shape_cast %43 : vector<1x1x1x128xf32> to vector<1x128xf32>
    %cst_31 = arith.constant dense<0.000000e+00> : vector<128xf32>
    %45 = vector.multi_reduction <add>, %33, %cst_31 [0] : vector<2x128xf32> to vector<128xf32>
    %46 = vector.shape_cast %45 : vector<128xf32> to vector<1x128xf32>
    %47 = arith.addf %44, %46 : vector<1x128xf32>
    %c0_32 = arith.constant 0 : index
    %c1_33 = arith.constant 1 : index
    %c0_34 = arith.constant 0 : index
    %c0_35 = arith.constant 0 : index
    %48 = vector.load %arg4[%c0_32, %c1_33, %c0_34, %c0_35] : memref<1x4x8x128xf32, #tpu.memory_space<vmem>>, vector<1x1x1x128xf32>
    %49 = vector.shape_cast %48 : vector<1x1x1x128xf32> to vector<1x128xf32>
    %50 = vector.shape_cast %47 : vector<1x128xf32> to vector<1x1x1x128xf32>
    tpu.vector_store %arg4[%c0_32, %c1_33, %c0_34, %c0_35], %50 {strides = array<i32>} : memref<1x4x8x128xf32, #tpu.memory_space<vmem>>, vector<1x1x1x128xf32>,
    %c0_36 = arith.constant 0 : index
    %c2_37 = arith.constant 2 : index
    %c0_38 = arith.constant 0 : index
    %c0_39 = arith.constant 0 : index
    %51 = vector.load %arg4[%c0_36, %c2_37, %c0_38, %c0_39] : memref<1x4x8x128xf32, #tpu.memory_space<vmem>>, vector<1x1x1x128xf32>
    %52 = vector.shape_cast %51 : vector<1x1x1x128xf32> to vector<1x128xf32>
    %53 = arith.select %32, %30, %29 : vector<2x128xi1>, vector<2x128xf32>
    %cst_40 = arith.constant dense<0.000000e+00> : vector<128xf32>
    %54 = vector.multi_reduction <add>, %53, %cst_40 [0] : vector<2x128xf32> to vector<128xf32>
    %55 = vector.shape_cast %54 : vector<128xf32> to vector<1x128xf32>
    %56 = arith.addf %52, %55 : vector<1x128xf32>
    %c0_41 = arith.constant 0 : index
    %c2_42 = arith.constant 2 : index
    %c0_43 = arith.constant 0 : index
    %c0_44 = arith.constant 0 : index
    %57 = vector.load %arg4[%c0_41, %c2_42, %c0_43, %c0_44] : memref<1x4x8x128xf32, #tpu.memory_space<vmem>>, vector<1x1x1x128xf32>
    %58 = vector.shape_cast %57 : vector<1x1x1x128xf32> to vector<1x128xf32>
    %59 = vector.shape_cast %56 : vector<1x128xf32> to vector<1x1x1x128xf32>
    tpu.vector_store %arg4[%c0_41, %c2_42, %c0_43, %c0_44], %59 {strides = array<i32>} : memref<1x4x8x128xf32, #tpu.memory_space<vmem>>, vector<1x1x1x128xf32>,
    %60 = arith.select %32, %6, %29 : vector<2x128xi1>, vector<2x128xf32>
    %c1_i32 = arith.constant 1 : i32
    %61 = vector.broadcast %c1_i32 : i32 to vector<2x128xi32>
    %62 = arith.cmpi eq, %4, %61 : vector<2x128xi32>
    %63 = arith.mulf %19, %27 : vector<2x128xf32>
    %c0_45 = arith.constant 0 : index
    %c0_46 = arith.constant 0 : index
    %c1_47 = arith.constant 1 : index
    %c0_48 = arith.constant 0 : index
    %64 = vector.load %arg4[%c0_45, %c0_46, %c1_47, %c0_48] : memref<1x4x8x128xf32, #tpu.memory_space<vmem>>, vector<1x1x1x128xf32>
    %65 = vector.shape_cast %64 : vector<1x1x1x128xf32> to vector<1x128xf32>
    %66 = arith.select %62, %63, %29 : vector<2x128xi1>, vector<2x128xf32>
    %cst_49 = arith.constant dense<0.000000e+00> : vector<128xf32>
    %67 = vector.multi_reduction <add>, %66, %cst_49 [0] : vector<2x128xf32> to vector<128xf32>
    %68 = vector.shape_cast %67 : vector<128xf32> to vector<1x128xf32>
    %69 = arith.addf %65, %68 : vector<1x128xf32>
    %c0_50 = arith.constant 0 : index
    %c0_51 = arith.constant 0 : index
    %c1_52 = arith.constant 1 : index
    %c0_53 = arith.constant 0 : index
    %70 = vector.load %arg4[%c0_50, %c0_51, %c1_52, %c0_53] : memref<1x4x8x128xf32, #tpu.memory_space<vmem>>, vector<1x1x1x128xf32>
    %71 = vector.shape_cast %70 : vector<1x1x1x128xf32> to vector<1x128xf32>
    %72 = vector.shape_cast %69 : vector<1x128xf32> to vector<1x1x1x128xf32>
    tpu.vector_store %arg4[%c0_50, %c0_51, %c1_52, %c0_53], %72 {strides = array<i32>} : memref<1x4x8x128xf32, #tpu.memory_space<vmem>>, vector<1x1x1x128xf32>,
    %c0_54 = arith.constant 0 : index
    %c1_55 = arith.constant 1 : index
    %c1_56 = arith.constant 1 : index
    %c0_57 = arith.constant 0 : index
    %73 = vector.load %arg4[%c0_54, %c1_55, %c1_56, %c0_57] : memref<1x4x8x128xf32, #tpu.memory_space<vmem>>, vector<1x1x1x128xf32>
    %74 = vector.shape_cast %73 : vector<1x1x1x128xf32> to vector<1x128xf32>
    %cst_58 = arith.constant dense<0.000000e+00> : vector<128xf32>
    %75 = vector.multi_reduction <add>, %63, %cst_58 [0] : vector<2x128xf32> to vector<128xf32>
    %76 = vector.shape_cast %75 : vector<128xf32> to vector<1x128xf32>
    %77 = arith.addf %74, %76 : vector<1x128xf32>
    %c0_59 = arith.constant 0 : index
    %c1_60 = arith.constant 1 : index
    %c1_61 = arith.constant 1 : index
    %c0_62 = arith.constant 0 : index
    %78 = vector.load %arg4[%c0_59, %c1_60, %c1_61, %c0_62] : memref<1x4x8x128xf32, #tpu.memory_space<vmem>>, vector<1x1x1x128xf32>
    %79 = vector.shape_cast %78 : vector<1x1x1x128xf32> to vector<1x128xf32>
    %80 = vector.shape_cast %77 : vector<1x128xf32> to vector<1x1x1x128xf32>
    tpu.vector_store %arg4[%c0_59, %c1_60, %c1_61, %c0_62], %80 {strides = array<i32>} : memref<1x4x8x128xf32, #tpu.memory_space<vmem>>, vector<1x1x1x128xf32>,
    %c0_63 = arith.constant 0 : index
    %c2_64 = arith.constant 2 : index
    %c1_65 = arith.constant 1 : index
    %c0_66 = arith.constant 0 : index
    %81 = vector.load %arg4[%c0_63, %c2_64, %c1_65, %c0_66] : memref<1x4x8x128xf32, #tpu.memory_space<vmem>>, vector<1x1x1x128xf32>
    %82 = vector.shape_cast %81 : vector<1x1x1x128xf32> to vector<1x128xf32>
    %83 = arith.select %62, %30, %29 : vector<2x128xi1>, vector<2x128xf32>
    %cst_67 = arith.constant dense<0.000000e+00> : vector<128xf32>
    %84 = vector.multi_reduction <add>, %83, %cst_67 [0] : vector<2x128xf32> to vector<128xf32>
    %85 = vector.shape_cast %84 : vector<128xf32> to vector<1x128xf32>
    %86 = arith.addf %82, %85 : vector<1x128xf32>
    %c0_68 = arith.constant 0 : index
    %c2_69 = arith.constant 2 : index
    %c1_70 = arith.constant 1 : index
    %c0_71 = arith.constant 0 : index
    %87 = vector.load %arg4[%c0_68, %c2_69, %c1_70, %c0_71] : memref<1x4x8x128xf32, #tpu.memory_space<vmem>>, vector<1x1x1x128xf32>
    %88 = vector.shape_cast %87 : vector<1x1x1x128xf32> to vector<1x128xf32>
    %89 = vector.shape_cast %86 : vector<1x128xf32> to vector<1x1x1x128xf32>
    tpu.vector_store %arg4[%c0_68, %c2_69, %c1_70, %c0_71], %89 {strides = array<i32>} : memref<1x4x8x128xf32, #tpu.memory_space<vmem>>, vector<1x1x1x128xf32>,
    %90 = arith.select %62, %8, %60 : vector<2x128xi1>, vector<2x128xf32>
    %c2_i32 = arith.constant 2 : i32
    %91 = vector.broadcast %c2_i32 : i32 to vector<2x128xi32>
    %92 = arith.cmpi eq, %4, %91 : vector<2x128xi32>
    %93 = arith.mulf %21, %27 : vector<2x128xf32>
    %c0_72 = arith.constant 0 : index
    %c0_73 = arith.constant 0 : index
    %c2_74 = arith.constant 2 : index
    %c0_75 = arith.constant 0 : index
    %94 = vector.load %arg4[%c0_72, %c0_73, %c2_74, %c0_75] : memref<1x4x8x128xf32, #tpu.memory_space<vmem>>, vector<1x1x1x128xf32>
    %95 = vector.shape_cast %94 : vector<1x1x1x128xf32> to vector<1x128xf32>
    %96 = arith.select %92, %93, %29 : vector<2x128xi1>, vector<2x128xf32>
    %cst_76 = arith.constant dense<0.000000e+00> : vector<128xf32>
    %97 = vector.multi_reduction <add>, %96, %cst_76 [0] : vector<2x128xf32> to vector<128xf32>
    %98 = vector.shape_cast %97 : vector<128xf32> to vector<1x128xf32>
    %99 = arith.addf %95, %98 : vector<1x128xf32>
    %c0_77 = arith.constant 0 : index
    %c0_78 = arith.constant 0 : index
    %c2_79 = arith.constant 2 : index
    %c0_80 = arith.constant 0 : index
    %100 = vector.load %arg4[%c0_77, %c0_78, %c2_79, %c0_80] : memref<1x4x8x128xf32, #tpu.memory_space<vmem>>, vector<1x1x1x128xf32>
    %101 = vector.shape_cast %100 : vector<1x1x1x128xf32> to vector<1x128xf32>
    %102 = vector.shape_cast %99 : vector<1x128xf32> to vector<1x1x1x128xf32>
    tpu.vector_store %arg4[%c0_77, %c0_78, %c2_79, %c0_80], %102 {strides = array<i32>} : memref<1x4x8x128xf32, #tpu.memory_space<vmem>>, vector<1x1x1x128xf32>,
    %c0_81 = arith.constant 0 : index
    %c1_82 = arith.constant 1 : index
    %c2_83 = arith.constant 2 : index
    %c0_84 = arith.constant 0 : index
    %103 = vector.load %arg4[%c0_81, %c1_82, %c2_83, %c0_84] : memref<1x4x8x128xf32, #tpu.memory_space<vmem>>, vector<1x1x1x128xf32>
    %104 = vector.shape_cast %103 : vector<1x1x1x128xf32> to vector<1x128xf32>
    %cst_85 = arith.constant dense<0.000000e+00> : vector<128xf32>
    %105 = vector.multi_reduction <add>, %93, %cst_85 [0] : vector<2x128xf32> to vector<128xf32>
    %106 = vector.shape_cast %105 : vector<128xf32> to vector<1x128xf32>
    %107 = arith.addf %104, %106 : vector<1x128xf32>
    %c0_86 = arith.constant 0 : index
    %c1_87 = arith.constant 1 : index
    %c2_88 = arith.constant 2 : index
    %c0_89 = arith.constant 0 : index
    %108 = vector.load %arg4[%c0_86, %c1_87, %c2_88, %c0_89] : memref<1x4x8x128xf32, #tpu.memory_space<vmem>>, vector<1x1x1x128xf32>
    %109 = vector.shape_cast %108 : vector<1x1x1x128xf32> to vector<1x128xf32>
    %110 = vector.shape_cast %107 : vector<1x128xf32> to vector<1x1x1x128xf32>
    tpu.vector_store %arg4[%c0_86, %c1_87, %c2_88, %c0_89], %110 {strides = array<i32>} : memref<1x4x8x128xf32, #tpu.memory_space<vmem>>, vector<1x1x1x128xf32>,
    %c0_90 = arith.constant 0 : index
    %c2_91 = arith.constant 2 : index
    %c2_92 = arith.constant 2 : index
    %c0_93 = arith.constant 0 : index
    %111 = vector.load %arg4[%c0_90, %c2_91, %c2_92, %c0_93] : memref<1x4x8x128xf32, #tpu.memory_space<vmem>>, vector<1x1x1x128xf32>
    %112 = vector.shape_cast %111 : vector<1x1x1x128xf32> to vector<1x128xf32>
    %113 = arith.select %92, %30, %29 : vector<2x128xi1>, vector<2x128xf32>
    %cst_94 = arith.constant dense<0.000000e+00> : vector<128xf32>
    %114 = vector.multi_reduction <add>, %113, %cst_94 [0] : vector<2x128xf32> to vector<128xf32>
    %115 = vector.shape_cast %114 : vector<128xf32> to vector<1x128xf32>
    %116 = arith.addf %112, %115 : vector<1x128xf32>
    %c0_95 = arith.constant 0 : index
    %c2_96 = arith.constant 2 : index
    %c2_97 = arith.constant 2 : index
    %c0_98 = arith.constant 0 : index
    %117 = vector.load %arg4[%c0_95, %c2_96, %c2_97, %c0_98] : memref<1x4x8x128xf32, #tpu.memory_space<vmem>>, vector<1x1x1x128xf32>
    %118 = vector.shape_cast %117 : vector<1x1x1x128xf32> to vector<1x128xf32>
    %119 = vector.shape_cast %116 : vector<1x128xf32> to vector<1x1x1x128xf32>
    tpu.vector_store %arg4[%c0_95, %c2_96, %c2_97, %c0_98], %119 {strides = array<i32>} : memref<1x4x8x128xf32, #tpu.memory_space<vmem>>, vector<1x1x1x128xf32>,
    %120 = arith.select %92, %10, %90 : vector<2x128xi1>, vector<2x128xf32>
    %c3_i32 = arith.constant 3 : i32
    %121 = vector.broadcast %c3_i32 : i32 to vector<2x128xi32>
    %122 = arith.cmpi eq, %4, %121 : vector<2x128xi32>
    %123 = arith.mulf %23, %27 : vector<2x128xf32>
    %c0_99 = arith.constant 0 : index
    %c0_100 = arith.constant 0 : index
    %c3_101 = arith.constant 3 : index
    %c0_102 = arith.constant 0 : index
    %124 = vector.load %arg4[%c0_99, %c0_100, %c3_101, %c0_102] : memref<1x4x8x128xf32, #tpu.memory_space<vmem>>, vector<1x1x1x128xf32>
    %125 = vector.shape_cast %124 : vector<1x1x1x128xf32> to vector<1x128xf32>
    %126 = arith.select %122, %123, %29 : vector<2x128xi1>, vector<2x128xf32>
    %cst_103 = arith.constant dense<0.000000e+00> : vector<128xf32>
    %127 = vector.multi_reduction <add>, %126, %cst_103 [0] : vector<2x128xf32> to vector<128xf32>
    %128 = vector.shape_cast %127 : vector<128xf32> to vector<1x128xf32>
    %129 = arith.addf %125, %128 : vector<1x128xf32>
    %c0_104 = arith.constant 0 : index
    %c0_105 = arith.constant 0 : index
    %c3_106 = arith.constant 3 : index
    %c0_107 = arith.constant 0 : index
    %130 = vector.load %arg4[%c0_104, %c0_105, %c3_106, %c0_107] : memref<1x4x8x128xf32, #tpu.memory_space<vmem>>, vector<1x1x1x128xf32>
    %131 = vector.shape_cast %130 : vector<1x1x1x128xf32> to vector<1x128xf32>
    %132 = vector.shape_cast %129 : vector<1x128xf32> to vector<1x1x1x128xf32>
    tpu.vector_store %arg4[%c0_104, %c0_105, %c3_106, %c0_107], %132 {strides = array<i32>} : memref<1x4x8x128xf32, #tpu.memory_space<vmem>>, vector<1x1x1x128xf32>,
    %c0_108 = arith.constant 0 : index
    %c1_109 = arith.constant 1 : index
    %c3_110 = arith.constant 3 : index
    %c0_111 = arith.constant 0 : index
    %133 = vector.load %arg4[%c0_108, %c1_109, %c3_110, %c0_111] : memref<1x4x8x128xf32, #tpu.memory_space<vmem>>, vector<1x1x1x128xf32>
    %134 = vector.shape_cast %133 : vector<1x1x1x128xf32> to vector<1x128xf32>
    %cst_112 = arith.constant dense<0.000000e+00> : vector<128xf32>
    %135 = vector.multi_reduction <add>, %123, %cst_112 [0] : vector<2x128xf32> to vector<128xf32>
    %136 = vector.shape_cast %135 : vector<128xf32> to vector<1x128xf32>
    %137 = arith.addf %134, %136 : vector<1x128xf32>
    %c0_113 = arith.constant 0 : index
    %c1_114 = arith.constant 1 : index
    %c3_115 = arith.constant 3 : index
    %c0_116 = arith.constant 0 : index
    %138 = vector.load %arg4[%c0_113, %c1_114, %c3_115, %c0_116] : memref<1x4x8x128xf32, #tpu.memory_space<vmem>>, vector<1x1x1x128xf32>
    %139 = vector.shape_cast %138 : vector<1x1x1x128xf32> to vector<1x128xf32>
    %140 = vector.shape_cast %137 : vector<1x128xf32> to vector<1x1x1x128xf32>
    tpu.vector_store %arg4[%c0_113, %c1_114, %c3_115, %c0_116], %140 {strides = array<i32>} : memref<1x4x8x128xf32, #tpu.memory_space<vmem>>, vector<1x1x1x128xf32>,
    %c0_117 = arith.constant 0 : index
    %c2_118 = arith.constant 2 : index
    %c3_119 = arith.constant 3 : index
    %c0_120 = arith.constant 0 : index
    %141 = vector.load %arg4[%c0_117, %c2_118, %c3_119, %c0_120] : memref<1x4x8x128xf32, #tpu.memory_space<vmem>>, vector<1x1x1x128xf32>
    %142 = vector.shape_cast %141 : vector<1x1x1x128xf32> to vector<1x128xf32>
    %143 = arith.select %122, %30, %29 : vector<2x128xi1>, vector<2x128xf32>
    %cst_121 = arith.constant dense<0.000000e+00> : vector<128xf32>
    %144 = vector.multi_reduction <add>, %143, %cst_121 [0] : vector<2x128xf32> to vector<128xf32>
    %145 = vector.shape_cast %144 : vector<128xf32> to vector<1x128xf32>
    %146 = arith.addf %142, %145 : vector<1x128xf32>
    %c0_122 = arith.constant 0 : index
    %c2_123 = arith.constant 2 : index
    %c3_124 = arith.constant 3 : index
    %c0_125 = arith.constant 0 : index
    %147 = vector.load %arg4[%c0_122, %c2_123, %c3_124, %c0_125] : memref<1x4x8x128xf32, #tpu.memory_space<vmem>>, vector<1x1x1x128xf32>
    %148 = vector.shape_cast %147 : vector<1x1x1x128xf32> to vector<1x128xf32>
    %149 = vector.shape_cast %146 : vector<1x128xf32> to vector<1x1x1x128xf32>
    tpu.vector_store %arg4[%c0_122, %c2_123, %c3_124, %c0_125], %149 {strides = array<i32>} : memref<1x4x8x128xf32, #tpu.memory_space<vmem>>, vector<1x1x1x128xf32>,
    %150 = arith.select %122, %12, %120 : vector<2x128xi1>, vector<2x128xf32>
    %c0_126 = arith.constant 0 : index
    %c3_127 = arith.constant 3 : index
    %c0_128 = arith.constant 0 : index
    %c0_129 = arith.constant 0 : index
    %151 = vector.load %arg4[%c0_126, %c3_127, %c0_128, %c0_129] : memref<1x4x8x128xf32, #tpu.memory_space<vmem>>, vector<1x1x1x128xf32>
    %152 = vector.shape_cast %151 : vector<1x1x1x128xf32> to vector<1x128xf32>
    %153 = arith.addf %28, %15 : vector<2x128xf32>
    %154 = arith.subf %153, %150 : vector<2x128xf32>
    %cst_130 = arith.constant dense<0.000000e+00> : vector<128xf32>
    %155 = vector.multi_reduction <add>, %154, %cst_130 [0] : vector<2x128xf32> to vector<128xf32>
    %156 = vector.shape_cast %155 : vector<128xf32> to vector<1x128xf32>
    %157 = arith.addf %152, %156 : vector<1x128xf32>
    %c0_131 = arith.constant 0 : index
    %c3_132 = arith.constant 3 : index
    %c0_133 = arith.constant 0 : index
    %c0_134 = arith.constant 0 : index
    %158 = vector.load %arg4[%c0_131, %c3_132, %c0_133, %c0_134] : memref<1x4x8x128xf32, #tpu.memory_space<vmem>>, vector<1x1x1x128xf32>
    %159 = vector.shape_cast %158 : vector<1x1x1x128xf32> to vector<1x128xf32>
    %160 = vector.shape_cast %157 : vector<1x128xf32> to vector<1x1x1x128xf32>
    tpu.vector_store %arg4[%c0_131, %c3_132, %c0_133, %c0_134], %160 {strides = array<i32>} : memref<1x4x8x128xf32, #tpu.memory_space<vmem>>, vector<1x1x1x128xf32>,
    return
  }
  func.func @transform_0(%arg0: i32, %arg1: i32) -> (i32, i32, i32, i32) {
    %c0_i32 = arith.constant 0 : i32
    %c0_i32_0 = arith.constant 0 : i32
    %c0_i32_1 = arith.constant 0 : i32
    return %arg0, %c0_i32, %arg1, %c0_i32_0 : i32, i32, i32, i32
  }
  func.func @transform_1(%arg0: i32, %arg1: i32) -> (i32, i32, i32) {
    %c0_i32 = arith.constant 0 : i32
    %c0_i32_0 = arith.constant 0 : i32
    return %arg0, %arg1, %c0_i32 : i32, i32, i32
  }
  func.func @transform_2(%arg0: i32, %arg1: i32) -> (i32, i32, i32, i32) {
    %c0_i32 = arith.constant 0 : i32
    %c0_i32_0 = arith.constant 0 : i32
    %c0_i32_1 = arith.constant 0 : i32
    %c0_i32_2 = arith.constant 0 : i32
    return %arg0, %c0_i32, %c0_i32_0, %c0_i32_1 : i32, i32, i32, i32
  }
}

</mosaic_0001>

<bundles_post_ra>
// kernel: tpu_custom_call.1
= control target key start
LH: loop header
LB: loop body
LE: loop exit
PB: predicated region body
PF: predicated region fallthrough
CT: control target
= control target key end

     0   :  { %7 = vsyncpa [#allocation3], 0  ;;  %s1107_s0 = inlined_call_operand.hbm [shape: f32[2,4,2,128], index: 0, kind: input, shape index: {}]   ;;  %s1108_s1 = inlined_call_operand.hbm [shape: s32[2,2,128], index: 1, kind: input, shape index: {}]   ;;  %s1109_s2 = inlined_call_operand.hbm [shape: f32[2,4,8,128], index: 2, kind: output, shape index: {}]  }
   0x1   :  { %9 = vsyncpa [#allocation3 + $0x1], 0 }
   0x2   :  { %10 = vsyncpa [#allocation6], 0 }
   0x3   :  { %12 = vsyncpa [#allocation6 + $0x1], 0 }
   0x4   :  { %13 = vsyncpa [#allocation4], 0 }
   0x5   :  { %15 = vsyncpa [#allocation4 + $0x1], 0  ;;  %s821_s9 = smov 0   ;;  %s823_s10 = smov 0  }
   0x6   :  { %s825_s11 = smov 0   ;;  %s827_s12 = smov 0  }
   0x7   :  { %s829_s13 = smov 0   ;;  %s831_s14 = smov 0  }
   0x8 LB: > { %s531_s15 = sadd.s32 4294967295, %s796_s14   ;;  %s532_s16 = sadd.s32 4294967294, %s796_s14   ;;  %s796_s14 = sphi %s831_s14, %s21_s14   ;;  %s792_s13 = sphi %s829_s13, %s1120_s13   ;;  %s788_s12 = sphi %s827_s12, %s1119_s12   ;;  %s784_s11 = sphi %s825_s11, %s1118_s11   ;;  %s780_s10 = sphi %s823_s10, %s1117_s10   ;;  %s776_s9 = sphi %s821_s9, %s1116_s9  }
   0x9   : > { %s33_s17 = sadd.s32 1, %s792_s13  ;;  %s42_s18 = sadd.s32 1, %s784_s11 }
   0xa   : > { %p35_p0 = scmp.ge.s32.totalorder %s33_s17, 2  ;;  %p49_p1 = scmp.ne.s32.totalorder %s784_s11, %s780_s10 }
   0xb   : > { %p50_p2 = scmp.eq.s32.totalorder %s796_s14, 0  ;;  %p55_p3 = scmp.ne.s32.totalorder %s780_s10, %s776_s9 }
   0xc   : > { %s1122_s17 = smov (%p35_p0, %s33_s17), 0  ;;  %p56_p5 = scmp.eq.s32.totalorder %s531_s15, 0 }
   0xd   : > { %p862_p4 = por %p50_p2, %p49_p1  ;;  %s37_s20 = ssub.s32 %s792_s13, %s1122_s17 }
   0xe   : > { %p107_p6 = scmp.eq.s32.totalorder %s531_s15, 1  ;;  %p40_p7 = scmp.eq.s32.totalorder %s37_s20, 0 }
   0xf   : > { %p868_p8 = por %p56_p5, %p55_p3  ;;  %p113_p10 = scmp.eq.s32.totalorder %s532_s16, 1 }
  0x10   : > { %p872_p9 = por %p107_p6, %p49_p1  ;;  %p534_p12 = scmp.ge.s32.totalorder %s796_s14, 2 }
  0x11   : > { %s877_s23 = scalar_select %p40_p7, %s784_s11, %s42_s18  }
  0x12   : > { %p879_p11 = por %p113_p10, %p55_p3  ;;  %p589_p13 = scmp.lt.s32.totalorder %s796_s14, 2 }
  0x13   : > { %s886_s25 = sand.u32 1, %s784_s11   ;;  %s570_s27 = sshll.u32 %s792_s13, 7 }
  0x14   : > { %s535_s26 = sshll.u32 %s886_s25, 3  ;;  %s144_s30 = scalar_lea.hbm %s1107_s0, %s570_s27 }
  0x15   : > { %s137_s3 = scalar_lea.vmem [#allocation2], %s535_s26  ;;  %p895_p0 = pnand %p589_p13, %p862_p4 }
  0x16   : > { %s145_s4 = sshll.u32 %s137_s3, 4  ;;  %p540_p1 = scmp.ge.s32.totalorder %s796_s14, 1  ;;  %s146_s4 = int_to_ptr.vmem [resolvable:$true] %s145_s4 }
  0x17   : > { %s134_s6 = scalar_lea.sflag [#allocation3], %s886_s25  ;;  %p658_p2 = pneg %p895_p0 }
  0x18   : > { %s669_s7 = scalar_lea.vmem %s146_s4, 128  ;;  %s798_s8 = smov [#allocation2]  }
  0x19   : > { %p670_p3 = scmp.ne.s32.totalorder %s146_s4, %s669_s7  ;;  %s674_s15 = sshll.u32 %s798_s8, 4  ;;  %s675_s15 = int_to_ptr.vmem [resolvable:$false] %s674_s15 }
  0x1a   : > { %s676_s16 = scalar_lea.vmem %s675_s15, 256  ;;  %p677_p4 = scmp.lt.s32.totalorder %s146_s4, %s675_s15 }
  0x1b   : > { %p672_p5 = pnand %p670_p3, %p658_p2  ;;  %p678_p7 = scmp.lt.s32.totalorder %s676_s16, %s669_s7 }
  0x1d   : > { %p673_p6 = pneg %p672_p5  ;;  %p679_p10 = por %p678_p7, %p677_p4 }
  0x1f   : > { %p680_p13 = pnand %p679_p10, %p673_p6 }
  0x21   : > { %683 = shalt.err (!%p680_p13)
}
  0x22   : > { %s799_s18 = smov 32   ;;  %s800_s19 = smov 2  }
  0x23   : > { %581 = dma.hbm_to_vmem [thread:$0]  (!%p895_p0), %s144_s30, 128, %s146_s4, %s134_s6, %s799_s18, %s799_s18, %s800_s19  }
  0x24   : > { %p172_p3 = scmp.lt.s32.totalorder %s796_s14, 3  ;;  %s538_s20 = sshll.u32 %s886_s25, 1 }
  0x25   : > { %s539_s26 = sshll.u32 %s792_s13, 5  ;;  %s159_s7 = scalar_lea.vmem [#allocation5], %s538_s20 }
  0x26   : > { %p913_p5 = pnand %p540_p1, %p172_p3  ;;  %s165_s3 = scalar_lea.hbm %s1108_s1, %s539_s26 }
  0x27   : > { %s167_s8 = sshll.u32 %s159_s7, 4  ;;  %s156_s15 = scalar_lea.sflag [#allocation6], %s886_s25  ;;  %s168_s8 = int_to_ptr.vmem [resolvable:$true] %s167_s8 }
  0x28   : > { %s697_s16 = scalar_lea.vmem %s168_s8, 32  ;;  %s801_s30 = smov [#allocation5]  }
  0x29   : > { %p698_p6 = scmp.ne.s32.totalorder %s168_s8, %s697_s16  ;;  %s702_s4 = sshll.u32 %s801_s30, 4  ;;  %s703_s4 = int_to_ptr.vmem [resolvable:$false] %s702_s4 }
  0x2a   : > { %s704_s6 = scalar_lea.vmem %s703_s4, 64  ;;  %p705_p1 = scmp.lt.s32.totalorder %s168_s8, %s703_s4 }
  0x2b   : > { %p700_p4 = pnand %p698_p6, %p658_p2  ;;  %p706_p10 = scmp.lt.s32.totalorder %s704_s6, %s697_s16 }
  0x2d   : > { %p701_p7 = pneg %p700_p4  ;;  %p707_p13 = por %p706_p10, %p705_p1 }
  0x2f   : > { %p708_p3 = pnand %p707_p13, %p701_p7 }
  0x31   : > { %711 = shalt.err (!%p708_p3)
}
  0x32   : > { %584 = dma.hbm_to_vmem [thread:$0]  (!%p895_p0), %s165_s3, 32, %s168_s8, %s156_s15  }
  0x33   : > { %176 = sbr.rel (%p913_p5) target bundleno = 157 (0x9d), region = 28  ;;  %s929_s25 = sand.u32 (!%p913_p5), 1, %s780_s10  }
  0x34   : > { %s541_s18 = sshll.u32 (!%p913_p5), %s929_s25, 3  ;;  %s179_s19 = scalar_lea.sflag (!%p913_p5), [#allocation3], %s929_s25 }
  0x35   : > { %s182_s20 = scalar_lea.vmem (!%p913_p5), [#allocation2], %s541_s18 }
  0x38   : > { %763 = dma.done.wait (%p868_p8), %s179_s19, 128  }
  0x39   : > { %765 = vsyncadd (%p868_p8), %s179_s19, 4294967168  ;;  %s542_s5 = sshll.u32 %s929_s25, 1  ;;  %s188_s26 = scalar_lea.sflag [#allocation6], %s929_s25 }
  0x3a   : > { %s191_s27 = scalar_lea.vmem [#allocation5], %s542_s5 }
  0x3b   : > { %767 = dma.done.wait (%p868_p8), %s188_s26, 32  }
  0x3c   : > { %769 = vsyncadd (%p868_p8), %s188_s26, 4294967264  ;;  %s543_s28 = sshll.u32 %s929_s25, 5  ;;  %v802_v0 = vmov 0.0   ;;  %vm258_vm0 = vcmask 1041408   ;;  %v950_v1 = vld [vmem:[%s191_s27] sm:$0x3] }
  0x3d   : > { %s944_s29 = scalar_lea.vmem [#allocation7], %s543_s28  ;;  %v952_v2 = vld [vmem:[%s182_s20] sm:$0x3]  ;;  %v954_v3 = vld [vmem:[%s182_s20 + $0x2] sm:$0x3]  ;;  %vm254_vm1 = vcmp.eq.s32.totalorder %v950_v1, 0 }
  0x3e   : > { %221 = vst [vmem:[%s944_s29] sm:$0xff] %v802_v0  ;;  %222 = vst [vmem:[%s944_s29 + $0x8] sm:$0xff] %v802_v0  ;;  %v956_v4 = vld [vmem:[%s182_s20 + $0x4] sm:$0x3]  ;;  %v233_v5 = vmax.f32 %v952_v2, %v954_v3  ;;  %v961_v6 = vld [vmem:[%s182_s20 + $0x6] sm:$0x3]  ;;  %v281_v7 = vsel %vm254_vm1, 1.0, %v802_v0 }
  0x3f   : > { %223 = vst [vmem:[%s944_s29 + $0x10] sm:$0xff] %v802_v0  ;;  %224 = vst [vmem:[%s944_s29 + $0x18] sm:$0xff] %v802_v0  ;;  %vm292_vm2 = vcmp.eq.s32.totalorder %v950_v1, 1  ;;  %v282_v9 = vsel %vm258_vm0, %v281_v7, 0.0  ;;  %vm327_vm3 = vcmp.eq.s32.totalorder %v950_v1, 2  ;;  %vm362_vm4 = vcmp.eq.s32.totalorder %v950_v1, 3 }
  0x40   : > { %v234_v8 = vmax.f32 %v233_v5, %v956_v4  ;;  %v316_v10 = vsel %vm292_vm2, 1.0, %v802_v0  ;;  %v283_v11 = vrot.slane %v282_v9, 4  ;;  %v351_v16 = vsel %vm327_vm3, 1.0, %v802_v0  ;;  %s571_s21 = sshll.u32 %s788_s12, 9  ;;  %s424_s3 = sshll.u32 %s944_s29, 4  ;;  %s1058_s3 = int_to_ptr.vmem [resolvable:$true] %s424_s3 }
  0x41   : > { %v317_v12 = vsel %vm258_vm0, %v316_v10, 0.0  ;;  %v352_v23 = vsel %vm258_vm0, %v351_v16, 0.0  ;;  %v386_v24 = vsel %vm362_vm4, 1.0, %v802_v0  ;;  %v291_v0 = vsel %vm254_vm1, %v952_v2, 0.0  ;;  %s1056_s15 = scalar_lea.hbm %s1109_s2, %s571_s21  ;;  %s411_s16 = scalar_lea.sflag [#allocation4], %s929_s25 }
  0x42   : > { %v972_v13 = vmax.f32 %v234_v8, %v961_v6  ;;  %v318_v14 = vrot.slane %v317_v12, 4  ;;  %v284_v15 = vadd.f32 %v283_v11, %v282_v9  ;;  %v353_v31 = vrot.slane %v352_v23, 4  ;;  %s712_s30 = scalar_lea.vmem %s1058_s3, 512  ;;  %s803_s12 = smov [#allocation7]  }
  0x43   : > { %v387_v32 = vsel %vm258_vm0, %v386_v24, 0.0  ;;  %v326_v5 = vsel %vm292_vm2, %v954_v3, %v291_v0  ;;  %p713_p8 = scmp.ne.s32.totalorder %s1058_s3, %s712_s30  ;;  %s716_s4 = sshll.u32 %s803_s12, 4  ;;  %s717_s4 = int_to_ptr.vmem [resolvable:$false] %s716_s4 }
  0x44   : > { %v236_v17 = vsub.f32 %v952_v2, %v972_v13  ;;  %v239_v18 = vsub.f32 %v954_v3, %v972_v13  ;;  %v242_v19 = vsub.f32 %v956_v4, %v972_v13  ;;  %v245_v20 = vsub.f32 %v961_v6, %v972_v13  ;;  %s718_s6 = scalar_lea.vmem %s717_s4, 1024  ;;  %p719_p5 = scmp.lt.s32.totalorder %s1058_s3, %s717_s4 }
  0x45   : > { %v285_v21 = vrot.slane %v284_v15, 2  ;;  %v319_v22 = vadd.f32 %v318_v14, %v317_v12  ;;  %v354_v35 = vadd.f32 %v353_v31, %v352_v23  ;;  %v388_v37 = vrot.slane %v387_v32, 4  ;;  %p714_p0 = pnand %p713_p8, %p872_p9  ;;  %p720_p6 = scmp.lt.s32.totalorder %s718_s6, %s712_s30 }
  0x46   : > { %v237_v25 = vmul.f32 1.442695, %v236_v17  ;;  %v240_v26 = vmul.f32 1.442695, %v239_v18  ;;  %v243_v27 = vmul.f32 1.442695, %v242_v19  ;;  %v361_v7 = vsel %vm327_vm3, %v956_v4, %v326_v5 }
  0x47   : > { %v246_v28 = vmul.f32 1.442695, %v245_v20  ;;  %v286_v29 = vadd.f32 %v285_v21, %v284_v15  ;;  %v320_v30 = vrot.slane %v319_v22, 2  ;;  %v549_v36 = vld [vmem:[%s944_s29 + $0x10] sm:$0x1]  ;;  %v355_v40 = vrot.slane %v354_v35, 2  ;;  %p715_p2 = pneg %p714_p0  ;;  %p721_p4 = por %p720_p6, %p719_p5 }
  0x48   : > { %644 = vpow2.f32 %v237_v25  ;;  %v553_v41 = vld [vmem:[%s944_s29 + $0x11] sm:$0x1]  ;;  %v389_v42 = vadd.f32 %v388_v37, %v387_v32  ;;  %v557_v49 = vld [vmem:[%s944_s29 + $0x12] sm:$0x1]  ;;  %v561_v54 = vld [vmem:[%s944_s29 + $0x13] sm:$0x1]  ;;  %v1012_v2 = vsel %vm362_vm4, %v961_v6, %v361_v7 }
  0x49   : > { %646 = vpow2.f32 %v240_v26  ;;  %v287_v33 = vrot.slane %v286_v29, 1  ;;  %v321_v34 = vadd.f32 %v320_v30, %v319_v22  ;;  %v356_v45 = vadd.f32 %v355_v40, %v354_v35  ;;  %p722_p7 = pnand %p721_p4, %p715_p2 }
  0x4a   : > { %648 = vpow2.f32 %v243_v27  ;;  %v390_v46 = vrot.slane %v389_v42, 2 }
  0x4b   : > { %650 = vpow2.f32 %v246_v28  ;;  %v288_v38 = vadd.f32 %v287_v33, %v286_v29  ;;  %v322_v39 = vrot.slane %v321_v34, 1  ;;  %v357_v48 = vrot.slane %v356_v45, 1 }
  0x4c   : > { %v391_v50 = vadd.f32 %v390_v46, %v389_v42 }
  0x4d   : > { %v289_v43 = vadd.f32 %v549_v36, %v288_v38  ;;  %v323_v44 = vadd.f32 %v322_v39, %v321_v34  ;;  %v358_v51 = vadd.f32 %v357_v48, %v356_v45  ;;  %v547_v48 = vld [vmem:[%s944_s29 + $0x8] sm:$0x1] }
  0x4e   : > { %v392_v52 = vrot.slane %v391_v50, 1 }
  0x4f   : > { %550 = vst [vmem:[%s944_s29 + $0x10] sm:$0x1] %v289_v43  ;;  %v324_v47 = vadd.f32 %v553_v41, %v323_v44  ;;  %v359_v53 = vadd.f32 %v557_v49, %v358_v51 }
  0x50   : > { %v393_v55 = vadd.f32 %v392_v52, %v391_v50 }
  0x51   : > { %554 = vst [vmem:[%s944_s29 + $0x11] sm:$0x1] %v324_v47  ;;  %558 = vst [vmem:[%s944_s29 + $0x12] sm:$0x1] %v359_v53 }
  0x52   : > { %v394_v58 = vadd.f32 %v561_v54, %v393_v55  ;;  %v551_v55 = vld [vmem:[%s944_s29 + $0x9] sm:$0x1] }
  0x54   : > { %562 = vst [vmem:[%s944_s29 + $0x13] sm:$0x1] %v394_v58  ;;  %v256_v58 = vld [vmem:[%s944_s29] sm:$0x1] }
  0x55   : > { %v645_v56 = vpop.eup %644 }
  0x56   : > { %v647_v57 = vpop.eup %646 }
  0x57   : > { %v649_v59 = vpop.eup %648  ;;  %v248_v60 = vadd.f32 %v647_v57, %v645_v56 }
  0x58   : > { %v651_v61 = vpop.eup %650 }
  0x59   : > { %v249_v62 = vadd.f32 %v649_v59, %v248_v60  ;;  %v294_v60 = vld [vmem:[%s944_s29 + $0x1] sm:$0x1] }
  0x5b   : > { %v250_v63 = vadd.f32 %v651_v61, %v249_v62 }
  0x5d   : > { %652 = vrcp.f32 %v250_v63 }
  0x5e   : > { %654 = vlog2.f32 %v250_v63 }
  0x6a   : > { %v653_v8 = vpop.eup %652 }
  0x6b   : > { %v655_v9 = vpop.eup %654  ;;  %v255_v10 = vmul.f32 %v653_v8, %v645_v56  ;;  %v293_v11 = vmul.f32 %v653_v8, %v647_v57  ;;  %v328_v12 = vmul.f32 %v653_v8, %v649_v59  ;;  %v363_v14 = vmul.f32 %v653_v8, %v651_v61  ;;  %v555_v8 = vld [vmem:[%s944_s29 + $0xa] sm:$0x1] }
  0x6c   : > { %v1007_v15 = vmul.f32 0.6931472, %v655_v9 }
  0x6d   : > { %v257_v3 = vsel %vm254_vm1, %v255_v10, 0.0  ;;  %v270_v16 = vsel %vm258_vm0, %v255_v10, 0.0  ;;  %v295_v4 = vsel %vm292_vm2, %v293_v11, 0.0  ;;  %v306_v17 = vsel %vm258_vm0, %v293_v11, 0.0 }
  0x6e   : > { %v259_v18 = vsel %vm258_vm0, %v257_v3, 0.0  ;;  %v271_v19 = vrot.slane %v270_v16, 4  ;;  %v296_v20 = vsel %vm258_vm0, %v295_v4, 0.0  ;;  %v307_v21 = vrot.slane %v306_v17, 4 }
  0x6f   : > { %v260_v22 = vrot.slane %v259_v18, 4  ;;  %v297_v23 = vrot.slane %v296_v20, 4  ;;  %v330_v6 = vsel %vm327_vm3, %v328_v12, 0.0  ;;  %v341_v24 = vsel %vm258_vm0, %v328_v12, 0.0  ;;  %v329_v12 = vld [vmem:[%s944_s29 + $0x2] sm:$0x1] }
  0x70   : > { %v272_v25 = vadd.f32 %v271_v19, %v270_v16  ;;  %v308_v26 = vadd.f32 %v307_v21, %v306_v17  ;;  %v331_v27 = vsel %vm258_vm0, %v330_v6, 0.0  ;;  %v342_v28 = vrot.slane %v341_v24, 4 }
  0x71   : > { %v261_v29 = vadd.f32 %v260_v22, %v259_v18  ;;  %v298_v30 = vadd.f32 %v297_v23, %v296_v20  ;;  %v332_v31 = vrot.slane %v331_v27, 4  ;;  %v365_v32 = vsel %vm362_vm4, %v363_v14, 0.0  ;;  %v364_v20 = vld [vmem:[%s944_s29 + $0x3] sm:$0x1] }
  0x72   : > { %v273_v33 = vrot.slane %v272_v25, 2  ;;  %v309_v34 = vrot.slane %v308_v26, 2  ;;  %v343_v35 = vadd.f32 %v342_v28, %v341_v24  ;;  %v366_v36 = vsel %vm258_vm0, %v365_v32, 0.0 }
  0x73   : > { %v262_v37 = vrot.slane %v261_v29, 2  ;;  %v299_v38 = vrot.slane %v298_v30, 2  ;;  %v333_v39 = vadd.f32 %v332_v31, %v331_v27  ;;  %v367_v40 = vrot.slane %v366_v36, 4  ;;  %v559_v27 = vld [vmem:[%s944_s29 + $0xb] sm:$0x1] }
  0x74   : > { %v274_v41 = vadd.f32 %v273_v33, %v272_v25  ;;  %v310_v42 = vadd.f32 %v309_v34, %v308_v26  ;;  %v344_v43 = vrot.slane %v343_v35, 2  ;;  %v376_v44 = vsel %vm258_vm0, %v363_v14, 0.0 }
  0x75   : > { %v263_v45 = vadd.f32 %v262_v37, %v261_v29  ;;  %v300_v1 = vadd.f32 %v299_v38, %v298_v30  ;;  %v334_v46 = vrot.slane %v333_v39, 2  ;;  %v368_v47 = vadd.f32 %v367_v40, %v366_v36 }
  0x76   : > { %v275_v49 = vrot.slane %v274_v41, 1  ;;  %v311_v50 = vrot.slane %v310_v42, 1  ;;  %v345_v51 = vadd.f32 %v344_v43, %v343_v35  ;;  %v377_v52 = vrot.slane %v376_v44, 4 }
  0x77   : > { %v264_v53 = vrot.slane %v263_v45, 1  ;;  %v301_v54 = vrot.slane %v300_v1, 1  ;;  %v335_v56 = vadd.f32 %v334_v46, %v333_v39  ;;  %v369_v57 = vrot.slane %v368_v47, 2 }
  0x78   : > { %v276_v59 = vadd.f32 %v275_v49, %v274_v41  ;;  %v312_v61 = vadd.f32 %v311_v50, %v310_v42  ;;  %v346_v62 = vrot.slane %v345_v51, 1  ;;  %v378_v63 = vadd.f32 %v377_v52, %v376_v44 }
  0x79   : > { %v265_v0 = vadd.f32 %v264_v53, %v263_v45  ;;  %v302_v5 = vadd.f32 %v301_v54, %v300_v1  ;;  %v336_v7 = vrot.slane %v335_v56, 1  ;;  %v370_v9 = vadd.f32 %v369_v57, %v368_v47 }
  0x7a   : > { %v277_v10 = vadd.f32 %v547_v48, %v276_v59  ;;  %v313_v11 = vadd.f32 %v551_v55, %v312_v61  ;;  %v347_v14 = vadd.f32 %v346_v62, %v345_v51  ;;  %v379_v3 = vrot.slane %v378_v63, 2 }
  0x7b   : > { %v266_v16 = vadd.f32 %v265_v0, %v256_v58  ;;  %v303_v4 = vadd.f32 %v302_v5, %v294_v60  ;;  %v337_v17 = vadd.f32 %v336_v7, %v335_v56  ;;  %v371_v18 = vrot.slane %v370_v9, 1 }
  0x7c   : > { %548 = vst [vmem:[%s944_s29 + $0x8] sm:$0x1] %v277_v10  ;;  %552 = vst [vmem:[%s944_s29 + $0x9] sm:$0x1] %v313_v11  ;;  %v348_v19 = vadd.f32 %v555_v8, %v347_v14  ;;  %v380_v21 = vadd.f32 %v379_v3, %v378_v63  ;;  %v399_v22 = vadd.f32 %v1007_v15, %v972_v13 }
  0x7d   : > { %267 = vst [vmem:[%s944_s29] sm:$0x1] %v266_v16  ;;  %304 = vst [vmem:[%s944_s29 + $0x1] sm:$0x1] %v303_v4  ;;  %v338_v23 = vadd.f32 %v337_v17, %v329_v12  ;;  %v372_v6 = vadd.f32 %v371_v18, %v370_v9 }
  0x7e   : > { %556 = vst [vmem:[%s944_s29 + $0xa] sm:$0x1] %v348_v19  ;;  %v381_v24 = vrot.slane %v380_v21, 1  ;;  %v400_v25 = vsub.f32 %v399_v22, %v1012_v2  ;;  %v563_v2 = vld [vmem:[%s944_s29 + $0x18] sm:$0x1] }
  0x7f   : > { %339 = vst [vmem:[%s944_s29 + $0x2] sm:$0x1] %v338_v23  ;;  %v373_v26 = vadd.f32 %v372_v6, %v364_v20 }
  0x80   : > { %v382_v28 = vadd.f32 %v381_v24, %v380_v21  ;;  %v401_v29 = vsel %vm258_vm0, %v400_v25, 0.0 }
  0x81   : > { %374 = vst [vmem:[%s944_s29 + $0x3] sm:$0x1] %v373_v26  ;;  %v402_v13 = vrot.slane %v401_v29, 4 }
  0x82   : > { %v383_v15 = vadd.f32 %v559_v27, %v382_v28 }
  0x83   : > { %v403_v30 = vadd.f32 %v402_v13, %v401_v29 }
  0x84   : > { %560 = vst [vmem:[%s944_s29 + $0xb] sm:$0x1] %v383_v15 }
  0x85   : > { %v404_v31 = vrot.slane %v403_v30, 2 }
  0x87   : > { %v405_v32 = vadd.f32 %v404_v31, %v403_v30 }
  0x89   : > { %v406_v33 = vrot.slane %v405_v32, 1 }
  0x8b   : > { %v407_v34 = vadd.f32 %v406_v33, %v405_v32 }
  0x8d   : > { %v408_v35 = vadd.f32 %v563_v2, %v407_v34 }
  0x8f   : > { %564 = vst [vmem:[%s944_s29 + $0x18] sm:$0x1] %v408_v35 }
  0x90   : > { %725 = shalt.err (!%p722_p7)
}
  0x91   : > { %s726_s18 = scalar_lea.hbm %s1056_s15, 512  ;;  %s730_s5 = scalar_lea.hbm %s1109_s2, 1024 }
  0x92   : > { %p727_p1 = scmp.ne.s32.totalorder %s1056_s15, %s726_s18  ;;  %p731_p3 = scmp.lt.s32.totalorder %s1056_s15, %s1109_s2 }
  0x93   : > { %p732_p8 = scmp.lt.s32.totalorder %s730_s5, %s726_s18 }
  0x94   : > { %p728_p10 = pnand %p727_p1, %p872_p9 }
  0x95   : > { %p733_p0 = por %p732_p8, %p731_p3 }
  0x96   : > { %p729_p13 = pneg %p728_p10 }
  0x98   : > { %p734_p2 = pnand %p733_p0, %p729_p13 }
  0x9a   : > { %737 = shalt.err (!%p734_p2)
}
  0x9b   : > { %s804_s28 = smov 128   ;;  %s805_s29 = smov 8  }
  0x9c   : > { %576 = dma.vmem_to_hbm [thread:$0]  (%p872_p9), %s1058_s3, 512, %s1056_s15, %s411_s16, %s804_s28, %s804_s28, %s805_s29  }
  0x9d PF: > { %s439_s21 = sand.u32 1, %s776_s9   ;;  %p586_p5 = pnand %p534_p12, %p879_p11 }
  0x9e   : > { %s440_s7 = scalar_lea.sflag [#allocation4], %s439_s21 }
  0x9f   : > { %p587_p6 = pneg %p586_p5 }
  0xa1   : > { %771 = dma.done.wait (%p587_p6), %s440_s7, 512  }
  0xa2   : > { %773 = vsyncadd (%p587_p6), %s440_s7, 4294966784  ;;  %s21_s14 = sadd.s32 1, %s796_s14   ;;  %s1116_s9 = smov %s780_s10 }
  0xa3   : > { %p18_p4 = scmp.ge.s32.totalorder %s21_s14, 4   ;;  %s1117_s10 = smov %s784_s11 }
  0xa4   : > { %s1118_s11 = smov %s877_s23  ;;  %s1119_s12 = smov %s792_s13 }
  0xa5   : > { %s1120_s13 = smov %s1122_s17  ;;  %20 = sbr.rel (!%p18_p4) target bundleno = 8 (0x8), region = 96 }
  0xaa   :  { %445 = vsyncpa [#allocation3], 1 }
  0xab   :  { %447 = vsyncpa [#allocation3 + $0x1], 1 }
  0xac   :  { %448 = vsyncpa [#allocation6], 1 }
  0xad   :  { %450 = vsyncpa [#allocation6 + $0x1], 1 }
  0xae   :  { %451 = vsyncpa [#allocation4], 1 }
  0xaf   :  { %453 = vsyncpa [#allocation4 + $0x1], 1 }

</bundles_post_ra>
